<compile_context>
chip_gen: v7x
topology: tpu7x:2x2x1
jax: 0.10.0
libtpu: 0.0.40
codegen_flags: <defaults>
</compile_context>

<pallas_src>
import jax
import jax.numpy as jnp
from jax.experimental import pallas as pl
from jax.experimental.pallas import tpu as pltpu


def _round_up(x, m):
    return (x + m - 1) // m * m


def _largest_aligned_divisor(n, max_tile, align):
    """Largest divisor of n that is a multiple of `align` and <= max_tile."""
    best = None
    d = align
    top = min(n, max_tile)
    while d <= top:
        if n % d == 0:
            best = d
        d += align
    return best


def _ffn_kernel_fused(x_ref, w_ref, b_ref, o_ref):
    # Full-K block: single MXU pass, bias + ReLU fused, no scratch / RMW.
    acc = jnp.dot(x_ref[...], w_ref[...], preferred_element_type=jnp.float32)
    acc = acc + b_ref[...].astype(jnp.float32)
    o_ref[...] = jnp.maximum(acc, 0.0).astype(o_ref.dtype)


def _ffn_kernel_ktiled(x_ref, w_ref, b_ref, o_ref, acc_ref):
    # K is the innermost ("arbitrary") grid axis; acc_ref is resident across it.
    k = pl.program_id(2)
    partial = jnp.dot(x_ref[...], w_ref[...], preferred_element_type=jnp.float32)

    @pl.when(k == 0)
    def _():
        acc_ref[...] = partial            # overwrite: no separate zero-fill

    @pl.when(k > 0)
    def _():
        acc_ref[...] += partial

    @pl.when(k == pl.num_programs(2) - 1)
    def _():
        y = acc_ref[...] + b_ref[...].astype(jnp.float32)
        o_ref[...] = jnp.maximum(y, 0.0).astype(o_ref.dtype)


def feed_forward(x, w, b, *, tm=None, tn=None, tk=None, out_dtype=None):
    """FeedForward forward pass: relu(x @ w + b).

    x: (B, T, n_embed), w: (n_embed, 4*n_embed), b: (4*n_embed,).
    f32 or bf16 inputs; accumulation is always f32. out_dtype defaults to
    x.dtype (pass jnp.bfloat16 to halve the output HBM writeback).
    """
    B, T, K = x.shape
    Kw, N = w.shape
    assert Kw == K, "weight K dim must match n_embed"
    assert b.shape == (N,), "bias must be (4*n_embed,)"

    out_dtype = jnp.dtype(out_dtype if out_dtype is not None else x.dtype)
    in_itemsize = jnp.dtype(x.dtype).itemsize
    w_itemsize = jnp.dtype(w.dtype).itemsize
    out_itemsize = out_dtype.itemsize

    M = B * T
    x2 = x.reshape(M, K)
    b2 = b.reshape(1, N)

    # dtype-aware sublane packing: 8 rows f32, 16 bf16, 32 int8/fp8.
    sublane = 8 * max(1, 4 // in_itemsize)

    # Generation-aware VMEM budget (128 MiB v5e/v6e; 64 MiB per TC on v7x).
    try:
        vmem_cap = int(pltpu.get_tpu_info().vmem_capacity_bytes)
    except Exception:
        vmem_cap = 64 * 1024 * 1024
    budget = int(vmem_cap * 0.70)

    def tile_bytes(tm_, tn_, tk_):
        return (2 * tm_ * tk_ * in_itemsize       # x tiles (double-buffered)
                + 2 * tk_ * tn_ * w_itemsize      # W tiles
                + 2 * tn_ * w_itemsize            # bias tiles
                + 2 * tm_ * tn_ * out_itemsize    # output tiles
                + tm_ * tn_ * 4)                  # f32 acc / dot intermediate

    # ---------------- tile selection ----------------
    tm_cap = _round_up(M, sublane)
    tm_ = tm if tm is not None else min(512, tm_cap)
    tm_ = min(_round_up(tm_, sublane), tm_cap)

    tn_cap = _round_up(N, 128)
    tn_ = tn if tn is not None else min(2048, tn_cap)
    tn_ = min(_round_up(tn_, 128), tn_cap)

    tk_ = K  # placeholder; fixed below

    def shrink_to_budget(min_tn, min_tm):
        nonlocal tm_, tn_
        while tile_bytes(tm_, tn_, tk_) > budget and tn is None and tn_ > min_tn:
            tn_ = max(min_tn, _round_up(tn_ // 2, 128))
        while tile_bytes(tm_, tn_, tk_) > budget and tm is None and tm_ > min_tm:
            tm_ = max(min_tm, _round_up(tm_ // 2, sublane))

    if tk is None:
        # Prefer full-K blocks (stream W exactly once, no accumulator RMW).
        tk_ = K
        shrink_to_budget(512, 256)
        if tile_bytes(tm_, tn_, tk_) > budget:
            cand = _largest_aligned_divisor(K, 2048, 128)
            if cand is not None and cand < K:
                tk_ = cand  # fall back to a tiled, exact-divisor reduction
    else:
        tk_ = min(tk, K)
        if tk_ < K and (tk_ % 128 != 0 or K % tk_ != 0):
            # K must be tiled exactly (edge garbage would corrupt the sum)
            # and 128-aligned for lane layout; fall back to full K.
            tk_ = K
    shrink_to_budget(256, sublane)

    k_tiled = tk_ < K
    nM = pl.cdiv(M, tm_)
    nN = pl.cdiv(N, tn_)
    nK = K // tk_ if k_tiled else 1

    # Outer-axis choice: with N outermost x is re-streamed nN times and W once
    # (per K stripe); with M outermost it is the other way round. Pick the
    # cheaper order (with a tiled K both operands re-stream, so it is neutral).
    x_bytes = M * K * in_itemsize
    w_bytes = K * N * w_itemsize
    n_outer = (nN * x_bytes + w_bytes) <= (nM * w_bytes + x_bytes)

    if k_tiled:
        if n_outer:
            grid = (nN, nM, nK)
            x_map = lambda j, i, k: (i, k)
            w_map = lambda j, i, k: (k, j)
            b_map = lambda j, i, k: (0, j)
            o_map = lambda j, i, k: (i, j)
        else:
            grid = (nM, nN, nK)
            x_map = lambda i, j, k: (i, k)
            w_map = lambda i, j, k: (k, j)
            b_map = lambda i, j, k: (0, j)
            o_map = lambda i, j, k: (i, j)
        kernel = _ffn_kernel_ktiled
        scratch = [pltpu.VMEM((tm_, tn_), jnp.float32)]
        semantics = ("parallel", "parallel", "arbitrary")
    else:
        if n_outer:
            grid = (nN, nM)
            x_map = lambda j, i: (i, 0)
            w_map = lambda j, i: (0, j)
            b_map = lambda j, i: (0, j)
            o_map = lambda j, i: (i, j)
        else:
            grid = (nM, nN)
            x_map = lambda i, j: (i, 0)
            w_map = lambda i, j: (0, j)
            b_map = lambda i, j: (0, j)
            o_map = lambda i, j: (i, j)
        kernel = _ffn_kernel_fused
        scratch = []
        semantics = ("parallel", "parallel")

    need = tile_bytes(tm_, tn_, tk_)
    vmem_limit = max(need + (8 << 20), 32 << 20)
    vmem_limit = int(min(vmem_limit, max(vmem_cap - (2 << 20), need)))

    out = pl.pallas_call(
        kernel,
        out_shape=jax.ShapeDtypeStruct((M, N), out_dtype),
        grid_spec=pltpu.PrefetchScalarGridSpec(
            num_scalar_prefetch=0,
            grid=grid,
            in_specs=[
                pl.BlockSpec((tm_, tk_), x_map),   # x tile
                pl.BlockSpec((tk_, tn_), w_map),   # W tile
                pl.BlockSpec((1, tn_), b_map),     # bias tile
            ],
            out_specs=pl.BlockSpec((tm_, tn_), o_map),
            scratch_shapes=scratch,
        ),
        compiler_params=pltpu.CompilerParams(
            dimension_semantics=semantics,
            vmem_limit_bytes=vmem_limit,
        ),
    )(x2, w, b2)

    return out.reshape(B, T, N)


if __name__ == "__main__":
    # Small, deterministic example consistent with the module.
    B, T, n_embed = 2, 8, 32
    hidden = n_embed * 4  # 128

    key = jax.random.PRNGKey(0)
    kx, kw, kb = jax.random.split(key, 3)

    x = jax.random.normal(kx, (B, T, n_embed), dtype=jnp.float32)
    w = jax.random.normal(kw, (n_embed, hidden), dtype=jnp.float32) * 0.02
    b = jax.random.normal(kb, (hidden,), dtype=jnp.float32) * 0.02

    y = feed_forward(x, w, b)
    y = jax.block_until_ready(y)

    y_ref = jnp.maximum(jnp.einsum("bte,eh->bth", x, w) + b, 0.0)
    assert y.shape == (B, T, hidden)
    assert jnp.allclose(y, y_ref, atol=1e-5, rtol=1e-5)

    # Second check: ragged token count (exercises the in-kernel edge block,
    # no host-side pad/slice) with 128-wide features.
    B2, T2, n_embed2 = 3, 5, 128
    hidden2 = n_embed2 * 4
    kx2, kw2, kb2 = jax.random.split(jax.random.PRNGKey(1), 3)
    x2 = jax.random.normal(kx2, (B2, T2, n_embed2), dtype=jnp.float32)
    w2 = jax.random.normal(kw2, (n_embed2, hidden2), dtype=jnp.float32) * 0.02
    b2 = jax.random.normal(kb2, (hidden2,), dtype=jnp.float32) * 0.02
    y2 = jax.block_until_ready(feed_forward(x2, w2, b2))
    y2_ref = jnp.maximum(jnp.einsum("bte,eh->bth", x2, w2) + b2, 0.0)
    assert jnp.allclose(y2, y2_ref, atol=1e-5, rtol=1e-5)

    print("KERNEL_OK")
</pallas_src>

<mosaic_0001>
module attributes {stable_mosaic.version = 11 : i64} {
  func.func @_ffn_kernel_fused(%arg0: i32, %arg1: i32, %arg2: memref<16x32xf32, #tpu.memory_space<vmem>>, %arg3: memref<32x128xf32, #tpu.memory_space<vmem>>, %arg4: memref<1x128xf32, #tpu.memory_space<vmem>>, %arg5: memref<16x128xf32, #tpu.memory_space<vmem>>) attributes {dimension_semantics = [#tpu.dimension_semantics<parallel>, #tpu.dimension_semantics<parallel>], iteration_bounds = array<i64: 1, 1>, scalar_prefetch = 0 : i64, scratch_operands = 0 : i64, tpu.core_type = #tpu.core_type<tc>, window_params = [{transform_indices = @transform_0, window_bounds = array<i64: 16, 32>}, {transform_indices = @transform_1, window_bounds = array<i64: 32, 128>}, {transform_indices = @transform_2, window_bounds = array<i64: 1, 128>}, {transform_indices = @transform_3, window_bounds = array<i64: 16, 128>}]} {
    %c0 = arith.constant 0 : index
    %c0_0 = arith.constant 0 : index
    %0 = vector.load %arg2[%c0, %c0_0] : memref<16x32xf32, #tpu.memory_space<vmem>>, vector<16x32xf32>
    %c0_1 = arith.constant 0 : index
    %c0_2 = arith.constant 0 : index
    %1 = vector.load %arg3[%c0_1, %c0_2] : memref<32x128xf32, #tpu.memory_space<vmem>>, vector<32x128xf32>
    %cst = arith.constant dense<0.000000e+00> : vector<16x128xf32>
    %2 = tpu.matmul %0, %1, %cst {dimension_numbers = #tpu.dot_dimension_numbers<[1], [0], [0], [1], [0, 0, 1, 1], [], []>} : vector<16x32xf32>, vector<32x128xf32>, vector<16x128xf32> -> vector<16x128xf32>
    %c0_3 = arith.constant 0 : index
    %c0_4 = arith.constant 0 : index
    %3 = vector.load %arg4[%c0_3, %c0_4] : memref<1x128xf32, #tpu.memory_space<vmem>>, vector<1x128xf32>
    %4 = vector.broadcast %3 : vector<1x128xf32> to vector<16x128xf32>
    %5 = arith.addf %2, %4 : vector<16x128xf32>
    %cst_5 = arith.constant 0.000000e+00 : f32
    %6 = vector.broadcast %cst_5 : f32 to vector<16x128xf32>
    %7 = arith.maximumf %5, %6 : vector<16x128xf32>
    %c0_6 = arith.constant 0 : index
    %c0_7 = arith.constant 0 : index
    %8 = vector.load %arg5[%c0_6, %c0_7] : memref<16x128xf32, #tpu.memory_space<vmem>>, vector<16x128xf32>
    tpu.vector_store %arg5[%c0_6, %c0_7], %7 {strides = array<i32>} : memref<16x128xf32, #tpu.memory_space<vmem>>, vector<16x128xf32>,
    return
  }
  func.func @transform_0(%arg0: i32, %arg1: i32) -> (i32, i32) {
    %c0_i32 = arith.constant 0 : i32
    %c0_i32_0 = arith.constant 0 : i32
    return %arg1, %c0_i32 : i32, i32
  }
  func.func @transform_1(%arg0: i32, %arg1: i32) -> (i32, i32) {
    %c0_i32 = arith.constant 0 : i32
    %c0_i32_0 = arith.constant 0 : i32
    return %c0_i32, %arg0 : i32, i32
  }
  func.func @transform_2(%arg0: i32, %arg1: i32) -> (i32, i32) {
    %c0_i32 = arith.constant 0 : i32
    %c0_i32_0 = arith.constant 0 : i32
    return %c0_i32, %arg0 : i32, i32
  }
  func.func @transform_3(%arg0: i32, %arg1: i32) -> (i32, i32) {
    %c0_i32 = arith.constant 0 : i32
    return %arg1, %arg0 : i32, i32
  }
}

</mosaic_0001>

<bundles_post_ra>
// kernel: tpu_custom_call.1
= control target key start
LH: loop header
LB: loop body
LE: loop exit
PB: predicated region body
PF: predicated region fallthrough
CT: control target
= control target key end

     0   :  { %8 = vsyncpa [#allocation3], 0  ;;  %s338_s0 = inlined_call_operand.hbm [shape: f32[16,32], index: 0, kind: input, shape index: {}]   ;;  %s339_s1 = inlined_call_operand.hbm [shape: f32[32,128], index: 1, kind: input, shape index: {}]   ;;  %s340_s2 = inlined_call_operand.vmem [shape: f32[1,128], index: 2, kind: input, shape index: {}]   ;;  %s341_s3 = inlined_call_operand.hbm [shape: f32[16,128], index: 3, kind: output, shape index: {}]  }
   0x1   :  { %9 = vsyncpa [#allocation6], 0 }
   0x2   :  { %10 = vsyncpa [#allocation4], 0  ;;  %s265_s12 = smov [#allocation2]   ;;  %s193_s16 = scalar_lea.hbm %s338_s0, 256 }
   0x3   :  { %s16_s13 = sshll.u32 %s265_s12, 4  ;;  %p194_p0 = scmp.ne.s32.totalorder %s338_s0, %s193_s16  ;;  %s17_s13 = int_to_ptr.vmem [resolvable:$true] %s16_s13 }
   0x4   :  { %p197_p1 = scmp.lt.u32.totalorder %s193_s16, %s338_s0 }
   0x6   :  { %p199_p2 = pnand %p197_p1, %p194_p0 }
   0x8   :  { %202 = shalt.err (!%p199_p2)
}
   0x9   :  { %s203_s21 = scalar_lea.vmem %s17_s13, 256  ;;  %p208_p4 = scmp.lt.s32.totalorder %s17_s13, %s17_s13 }
   0xa   :  { %p204_p3 = scmp.ne.s32.totalorder %s17_s13, %s203_s21  ;;  %p209_p5 = scmp.lt.s32.totalorder %s203_s21, %s203_s21 }
   0xc   :  { %p210_p6 = por %p209_p5, %p208_p4 }
   0xe   :  { %p211_p7 = pnand %p210_p6, %p204_p3 }
  0x10   :  { %214 = shalt.err (!%p211_p7)
}
  0x11   :  { %s266_s22 = smov 128   ;;  %s267_s23 = smov 8  }
  0x12   :  { %22 = dma.hbm_to_vmem [thread:$0]  %s338_s0, 256, %s17_s13, [#allocation3], %s266_s22, %s266_s22, %s267_s23  }
  0x13   :  { %s268_s26 = smov [#allocation5]   ;;  %s215_s30 = scalar_lea.hbm %s339_s1, 512 }
  0x14   :  { %s28_s27 = sshll.u32 %s268_s26, 4  ;;  %p216_p8 = scmp.ne.s32.totalorder %s339_s1, %s215_s30  ;;  %s29_s27 = int_to_ptr.vmem [resolvable:$true] %s28_s27 }
  0x15   :  { %p219_p9 = scmp.lt.u32.totalorder %s215_s30, %s339_s1 }
  0x17   :  { %p221_p10 = pnand %p219_p9, %p216_p8 }
  0x19   :  { %224 = shalt.err (!%p221_p10)
}
  0x1a   :  { %s225_s8 = scalar_lea.vmem %s29_s27, 512  ;;  %p230_p12 = scmp.lt.s32.totalorder %s29_s27, %s29_s27 }
  0x1b   :  { %p226_p11 = scmp.ne.s32.totalorder %s29_s27, %s225_s8  ;;  %p231_p13 = scmp.lt.s32.totalorder %s225_s8, %s225_s8 }
  0x1d   :  { %p232_p0 = por %p231_p13, %p230_p12 }
  0x1f   :  { %p233_p1 = pnand %p232_p0, %p226_p11 }
  0x21   :  { %236 = shalt.err (!%p233_p1)
}
  0x22   :  { %34 = dma.hbm_to_vmem [thread:$0]  %s339_s1, 512, %s29_s27, [#allocation6], %s266_s22, %s266_s22, %s267_s23  }
  0x23   :  { %259 = dma.done.wait [#allocation3], 256  }
  0x24   :  { %260 = vsyncadd [#allocation3], 4294967040 }
  0x25   :  { %261 = dma.done.wait [#allocation6], 512  }
  0x26   :  { %262 = vsyncadd [#allocation6], 4294966784  ;;  %vm56_vm0 = vcmask 261120   ;;  %v45_v0 = vld [vmem:[#allocation5] sm:$0xff]  ;;  %v46_v1 = vld [vmem:[#allocation5 + $0x8] sm:$0xff]  ;;  %s269_s11 = smov [#allocation7]  }
  0x27   :  { %v47_v2 = vld [vmem:[#allocation5 + $0x10] sm:$0xff]  ;;  %v180_v3 = vpack.c.bf16 %v46_v1, %v45_v0  ;;  %v48_v4 = vld [vmem:[#allocation5 + $0x18] sm:$0xff]  ;;  %s147_s12 = sshll.u32 %s269_s11, 4  ;;  %s148_s12 = int_to_ptr.vmem [resolvable:$true] %s147_s12 }
  0x28   :  { %v43_v5 = vld [vmem:[#allocation2] sm:$0xff]  ;;  %v184_v6 = vpack.c.bf16 %v48_v4, %v47_v2  ;;  %v44_v7 = vld [vmem:[#allocation2 + $0x8] sm:$0xff]  ;;  %s237_s13 = scalar_lea.vmem %s148_s12, 256  ;;  %p242_p3 = scmp.lt.s32.totalorder %s148_s12, %s148_s12 }
  0x29   :  { %177 = vmatprep.mubr.msk.f32.mxu0 %vm56_vm0, %v43_v5  ;;  %181 = vmatprep.subr.bf16.mxu0 %v180_v3  ;;  %v160_v8 = vld [vmem:[%s340_s2] ss:$0 sm:$0xff]  ;;  %p238_p2 = scmp.ne.s32.totalorder %s148_s12, %s237_s13  ;;  %p243_p4 = scmp.lt.s32.totalorder %s237_s13, %s237_s13 }
  0x2a   :  { %183 = vmatpush3.bf16.msra.mxu0 %v180_v3 }
  0x2b   :  { %185 = vmatprep.subr.bf16.mxu0 %v184_v6  ;;  %p244_p5 = por %p243_p4, %p242_p3 }
  0x2d   :  { %p245_p6 = pnand %p244_p5, %p238_p2 }
  0x2e   :  { %187 = vmatpush3.bf16.msra.mxu0 %v184_v6 }
  0x31   :  { %178 = vmatmul.mubr.msk.f32.vlgmr.msra.gmra.mrb[0].mxu0 %vm56_vm0, %v44_v7 }
 0x104   :  { %v179_v9 = vpop.f32.mrb[0].mxu0 }
 0x105   :  { %v135_v10 = vadd.f32 %v179_v9, %v160_v8  ;;  %v129_v11 = vpop.f32.mrb[1].mxu0 }
 0x106   :  { %v130_v12 = vadd.f32 %v160_v8, %v129_v11 }
 0x107   :  { %v139_v13 = vmax.f32 %v135_v10, 0.0 }
 0x108   :  { %v138_v14 = vmax.f32 %v130_v12, 0.0 }
 0x109   :  { %141 = vst [vmem:[#allocation7 + $0x8] sm:$0xff] %v139_v13 }
 0x10a   :  { %140 = vst [vmem:[#allocation7] sm:$0xff] %v138_v14 }
 0x10b   :  { %248 = shalt.err (!%p245_p6)
}
 0x10c   :  { %s249_s15 = scalar_lea.hbm %s341_s3, 256 }
 0x10d   :  { %p250_p7 = scmp.ne.s32.totalorder %s341_s3, %s249_s15  ;;  %p253_p8 = scmp.lt.u32.totalorder %s249_s15, %s341_s3 }
 0x10f   :  { %p255_p9 = pnand %p253_p8, %p250_p7 }
 0x111   :  { %258 = shalt.err (!%p255_p9)
}
 0x112   :  { %153 = dma.vmem_to_hbm [thread:$0]  %s148_s12, 256, %s341_s3, [#allocation4], %s266_s22, %s266_s22, %s267_s23  }
 0x113   :  { %263 = dma.done.wait [#allocation4], 256  }
 0x114   :  { %264 = vsyncadd [#allocation4], 4294967040 }
 0x115   :  { %157 = vsyncpa [#allocation3], 1 }
 0x116   :  { %158 = vsyncpa [#allocation6], 1 }
 0x117   :  { %159 = vsyncpa [#allocation4], 1 }

</bundles_post_ra>
